<compile_context>
chip_gen: v7x
topology: tpu7x:2x2x1
jax: 0.10.0
libtpu: 0.0.40
codegen_flags: <defaults>
</compile_context>

<pallas_src>
import math

import jax
import jax.numpy as jnp
from jax.experimental import pallas as pl
from jax.experimental.pallas import tpu as pltpu


def _linear_readout_kernel(z_ref, wt_ref, b_ref, o_ref):
    """o = z @ W_T + b.

    z_ref: [tm, H], wt_ref: [H, O] (pre-transposed once at setup), b_ref: [1, O],
    o_ref: [tm, O].  Plain MXU contraction with f32 accumulation; bias broadcasts
    over the sublane (row) axis.
    """
    acc = jnp.dot(z_ref[...], wt_ref[...], preferred_element_type=jnp.float32)
    o_ref[...] = (acc + b_ref[...]).astype(o_ref.dtype)


def _tpu_hw():
    """(vmem_capacity_bytes, num_tensorcores) with conservative fallbacks."""
    vmem_capacity = 64 << 20          # conservative: v7x per-TC physical VMEM
    num_tc = 1
    try:
        info = pltpu.get_tpu_info()
        vmem_capacity = int(getattr(info, "vmem_capacity_bytes", vmem_capacity))
    except Exception:
        pass
    try:
        if "v7" in jax.devices()[0].device_kind.lower():
            num_tc = 2
    except Exception:
        pass
    return vmem_capacity, num_tc


def _vmem_limit(needed_bytes, vmem_capacity):
    """Scoped-VMEM limit: generous headroom over the block footprint, capped by HW."""
    limit = max(2 * needed_bytes + (1 << 20), 32 << 20)
    return int(min(limit, max(vmem_capacity - (4 << 20), 32 << 20)))


def prepare_linear_readout_params(weight, bias):
    """One-time parameter prep (outside the per-call hot path).

    weight: [O, H] in PyTorch nn.Linear layout -> returns ([H, O] W^T, [1, O] bias row).
    """
    return weight.T, bias.reshape(1, -1)


def linear_readout(z, weight_t, bias2d, *, batch_tile=1024, force_tiled=False):
    """z: [B, H] f32; weight_t: [H, O] (pre-transposed); bias2d: [1, O]."""
    B, H = z.shape
    Hw, O = weight_t.shape
    assert H == Hw and bias2d.shape == (1, O)

    vmem_capacity, num_tc = _tpu_hw()
    bytes_per_row = (H + O) * 4        # f32 z row read + output row write

    if num_tc >= 2:
        # v7x: two TensorCores — prefer the tiled "parallel" path early so the batch
        # shards across both cores' DMA paths.
        nogrid_cutoff = batch_tile
    else:
        # Single-TC (v5e/v6e): the grid only adds per-step machinery; one big
        # single-shot block streams at full HBM bandwidth up to ~1/4 of VMEM.
        nogrid_cutoff = max(batch_tile,
                            min(4096, (vmem_capacity // 4) // bytes_per_row))

    if B <= nogrid_cutoff and not force_tiled:
        # Tiny / overhead-dominated regime: no grid, no index maps — one shot with all
        # operands resident in VMEM (avoids ~0.35 us/step grid machinery for zero work).
        needed = B * bytes_per_row + (H * O + O) * 4
        return pl.pallas_call(
            _linear_readout_kernel,
            out_shape=jax.ShapeDtypeStruct((B, O), z.dtype),
            in_specs=[
                pl.BlockSpec(memory_space=pltpu.MemorySpace.VMEM),
                pl.BlockSpec(memory_space=pltpu.MemorySpace.VMEM),
                pl.BlockSpec(memory_space=pltpu.MemorySpace.VMEM),
            ],
            out_specs=pl.BlockSpec(memory_space=pltpu.MemorySpace.VMEM),
            compiler_params=pltpu.CompilerParams(
                vmem_limit_bytes=_vmem_limit(needed, vmem_capacity)),
        )(z, weight_t, bias2d)

    # Large-batch regime: HBM-read-bound on z (~1 flop/byte). Tile only the batch axis
    # with big tiles; keep the tiny [H, O] weight + [1, O] bias VMEM-resident across
    # steps; mark the batch axis "parallel" (shards across v7x's 2 TensorCores).
    tm = min(batch_tile, ((B + 7) // 8) * 8)
    steps = math.ceil(B / tm)
    if num_tc >= 2 and steps > 1 and steps % 2 == 1:
        # Balance the grid across the 2 TensorCores (avoid a lone tail step on one TC).
        steps += 1
        tm = ((math.ceil(B / steps) + 7) // 8) * 8
        steps = math.ceil(B / tm)

    # Double-buffered z tile dominates VMEM; keep it within the scoped limit.
    needed = 2 * tm * bytes_per_row + (H * O + O) * 4
    return pl.pallas_call(
        _linear_readout_kernel,
        out_shape=jax.ShapeDtypeStruct((B, O), z.dtype),
        grid=(steps,),
        in_specs=[
            pl.BlockSpec((tm, H), lambda i: (i, 0)),   # z tile marches over batch
            pl.BlockSpec((H, O), lambda i: (0, 0)),    # weight resident across steps
            pl.BlockSpec((1, O), lambda i: (0, 0)),    # bias resident across steps
        ],
        out_specs=pl.BlockSpec((tm, O), lambda i: (i, 0)),
        compiler_params=pltpu.CompilerParams(
            dimension_semantics=("parallel",),
            vmem_limit_bytes=_vmem_limit(needed, vmem_capacity)),
    )(z, weight_t, bias2d)


if __name__ == "__main__":
    out_dim = 2
    hidden_dim = 512      # module default
    batch = 8

    key = jax.random.PRNGKey(0)
    k_z, k_w, k_b, k_z2 = jax.random.split(key, 4)

    # Deterministic params mimicking nn.Linear init: U(-1/sqrt(H), 1/sqrt(H)).
    bound = 1.0 / math.sqrt(hidden_dim)
    weight = jax.random.uniform(k_w, (out_dim, hidden_dim), jnp.float32,
                                minval=-bound, maxval=bound)
    bias = jax.random.uniform(k_b, (out_dim,), jnp.float32,
                              minval=-bound, maxval=bound)

    # One-time parameter prep: W pre-transposed to [H, O] (MXU-friendly stationary RHS)
    # and bias as a [1, O] row for sublane broadcast.
    weight_t, bias2d = prepare_linear_readout_params(weight, bias)

    # --- module-default shape (B=8): single-shot no-grid path ---
    z = jax.random.normal(k_z, (batch, hidden_dim), jnp.float32)
    out = jax.block_until_ready(linear_readout(z, weight_t, bias2d))
    ref = z @ weight.T + bias
    assert out.shape == (batch, out_dim)
    assert jnp.allclose(out, ref, atol=1e-5, rtol=1e-5)

    # --- tiled path with a batch that is NOT a multiple of the tile
    #     (exercises the partial-block masked writeback) ---
    big_batch = 520
    z_big = jax.random.normal(k_z2, (big_batch, hidden_dim), jnp.float32)
    out_big = jax.block_until_ready(
        linear_readout(z_big, weight_t, bias2d, batch_tile=256, force_tiled=True))
    ref_big = z_big @ weight.T + bias
    assert out_big.shape == (big_batch, out_dim)
    assert jnp.allclose(out_big, ref_big, atol=1e-4, rtol=1e-4)

    print("KERNEL_OK")
</pallas_src>

<mosaic_0001>
module attributes {stable_mosaic.version = 11 : i64} {
  func.func @_linear_readout_kernel(%arg0: memref<8x512xf32, #tpu.memory_space<vmem>>, %arg1: memref<512x2xf32, #tpu.memory_space<vmem>>, %arg2: memref<1x2xf32, #tpu.memory_space<vmem>>, %arg3: memref<8x2xf32, #tpu.memory_space<vmem>>) attributes {dimension_semantics = [], scalar_prefetch = 0 : i64, scratch_operands = 0 : i64, tpu.core_type = #tpu.core_type<tc>} {
    %c0 = arith.constant 0 : index
    %c0_0 = arith.constant 0 : index
    %0 = vector.load %arg0[%c0, %c0_0] : memref<8x512xf32, #tpu.memory_space<vmem>>, vector<8x512xf32>
    %c0_1 = arith.constant 0 : index
    %c0_2 = arith.constant 0 : index
    %1 = vector.load %arg1[%c0_1, %c0_2] : memref<512x2xf32, #tpu.memory_space<vmem>>, vector<512x2xf32>
    %cst = arith.constant dense<0.000000e+00> : vector<8x2xf32>
    %2 = tpu.matmul %0, %1, %cst {dimension_numbers = #tpu.dot_dimension_numbers<[1], [0], [0], [1], [0, 0, 1, 1], [], []>} : vector<8x512xf32>, vector<512x2xf32>, vector<8x2xf32> -> vector<8x2xf32>
    %c0_3 = arith.constant 0 : index
    %c0_4 = arith.constant 0 : index
    %3 = vector.load %arg2[%c0_3, %c0_4] : memref<1x2xf32, #tpu.memory_space<vmem>>, vector<1x2xf32>
    %4 = vector.broadcast %3 : vector<1x2xf32> to vector<8x2xf32>
    %5 = arith.addf %2, %4 : vector<8x2xf32>
    %c0_5 = arith.constant 0 : index
    %c0_6 = arith.constant 0 : index
    %6 = vector.load %arg3[%c0_5, %c0_6] : memref<8x2xf32, #tpu.memory_space<vmem>>, vector<8x2xf32>
    tpu.vector_store %arg3[%c0_5, %c0_6], %5 {strides = array<i32>} : memref<8x2xf32, #tpu.memory_space<vmem>>, vector<8x2xf32>,
    return
  }
}

</mosaic_0001>

<bundles_post_ra>
// kernel: tpu_custom_call.1
= control target key start
LH: loop header
LB: loop body
LE: loop exit
PB: predicated region body
PF: predicated region fallthrough
CT: control target
= control target key end

     0   :  { %vm229_vm0 = vcmask 15360   ;;  %s600_s1 = inlined_call_operand.vmem [shape: f32[512,2], index: 1, kind: input, shape index: {}]   ;;  %s601_s0 = inlined_call_operand.vmem [shape: f32[8,512], index: 0, kind: input, shape index: {}]   ;;  %s602_s2 = inlined_call_operand.vmem [shape: f32[1,2], index: 2, kind: input, shape index: {}]   ;;  %s603_s3 = inlined_call_operand.vmem [shape: f32[8,2], index: 3, kind: output, shape index: {}]  }
   0x1   :  { %v34_v0 = vld [vmem:[%s600_s1 + $0x80] sm:$0xff]  ;;  %v35_v1 = vld [vmem:[%s600_s1 + $0x88] sm:$0xff]  ;;  %v36_v11 = vld [vmem:[%s600_s1 + $0x90] sm:$0xff] }
   0x2   :  { %v18_v2 = vld [vmem:[%s600_s1] sm:$0xff]  ;;  %v306_v3 = vpack.c.bf16 %v35_v1, %v34_v0  ;;  %v19_v4 = vld [vmem:[%s600_s1 + $0x8] sm:$0xff]  ;;  %v37_v13 = vld [vmem:[%s600_s1 + $0x98] sm:$0xff] }
   0x3   :  { %v66_v5 = vld [vmem:[%s600_s1 + $0x180] sm:$0xff]  ;;  %v67_v6 = vld [vmem:[%s600_s1 + $0x188] sm:$0xff]  ;;  %v308_v7 = vpack.c.bf16 %v19_v4, %v18_v2  ;;  %v20_v14 = vld [vmem:[%s600_s1 + $0x10] sm:$0xff]  ;;  %v310_v16 = vpack.c.bf16 %v37_v13, %v36_v11 }
   0x4   :  { %v338_v8 = vpack.c.bf16 %v67_v6, %v66_v5  ;;  %v50_v9 = vld [vmem:[%s600_s1 + $0x100] sm:$0xff]  ;;  %v51_v10 = vld [vmem:[%s600_s1 + $0x108] sm:$0xff]  ;;  %307 = vmatprep.subr.bf16.mxu0 %v306_v3  ;;  %v21_v15 = vld [vmem:[%s600_s1 + $0x18] sm:$0xff] }
   0x5   :  { %v340_v12 = vpack.c.bf16 %v51_v10, %v50_v9  ;;  %309 = vmatpush3.bf16.msra.mxu0 %v308_v7  ;;  %v312_v17 = vpack.c.bf16 %v21_v15, %v20_v14  ;;  %v68_v18 = vld [vmem:[%s600_s1 + $0x190] sm:$0xff]  ;;  %v69_v19 = vld [vmem:[%s600_s1 + $0x198] sm:$0xff]  ;;  %v38_v23 = vld [vmem:[%s600_s1 + $0xa0] sm:$0xff] }
   0x6   :  { %339 = vmatprep.subr.bf16.mxu1 %v338_v8  ;;  %v52_v20 = vld [vmem:[%s600_s1 + $0x110] sm:$0xff]  ;;  %v342_v21 = vpack.c.bf16 %v69_v19, %v68_v18  ;;  %v53_v22 = vld [vmem:[%s600_s1 + $0x118] sm:$0xff]  ;;  %v39_v24 = vld [vmem:[%s600_s1 + $0xa8] sm:$0xff]  ;;  %311 = vmatprep.subr.bf16.mxu0 %v310_v16 }
   0x7   :  { %341 = vmatpush3.bf16.msra.mxu1 %v340_v12  ;;  %v344_v25 = vpack.c.bf16 %v53_v22, %v52_v20  ;;  %v314_v26 = vpack.c.bf16 %v39_v24, %v38_v23  ;;  %v22_v27 = vld [vmem:[%s600_s1 + $0x20] sm:$0xff]  ;;  %v23_v28 = vld [vmem:[%s600_s1 + $0x28] sm:$0xff]  ;;  %v40_v35 = vld [vmem:[%s600_s1 + $0xb0] sm:$0xff] }
   0x8   :  { %v70_v29 = vld [vmem:[%s600_s1 + $0x1a0] sm:$0xff]  ;;  %343 = vmatprep.subr.bf16.mxu1 %v342_v21  ;;  %v71_v30 = vld [vmem:[%s600_s1 + $0x1a8] sm:$0xff]  ;;  %v316_v33 = vpack.c.bf16 %v23_v28, %v22_v27  ;;  %v41_v36 = vld [vmem:[%s600_s1 + $0xb8] sm:$0xff] }
   0x9   :  { %v54_v31 = vld [vmem:[%s600_s1 + $0x120] sm:$0xff]  ;;  %v55_v32 = vld [vmem:[%s600_s1 + $0x128] sm:$0xff]  ;;  %313 = vmatpush3.bf16.msra.mxu0 %v312_v17  ;;  %v346_v34 = vpack.c.bf16 %v71_v30, %v70_v29  ;;  %v24_v37 = vld [vmem:[%s600_s1 + $0x30] sm:$0xff]  ;;  %v318_v39 = vpack.c.bf16 %v41_v36, %v40_v35 }
   0xa   :  { %315 = vmatprep.subr.bf16.mxu0 %v314_v26  ;;  %v348_v38 = vpack.c.bf16 %v55_v32, %v54_v31  ;;  %v25_v40 = vld [vmem:[%s600_s1 + $0x38] sm:$0xff]  ;;  %v72_v41 = vld [vmem:[%s600_s1 + $0x1b0] sm:$0xff]  ;;  %v42_v46 = vld [vmem:[%s600_s1 + $0xc0] sm:$0xff] }
   0xb   :  { %345 = vmatpush3.bf16.msra.mxu1 %v344_v25  ;;  %v73_v42 = vld [vmem:[%s600_s1 + $0x1b8] sm:$0xff]  ;;  %v56_v44 = vld [vmem:[%s600_s1 + $0x130] sm:$0xff]  ;;  %v43_v47 = vld [vmem:[%s600_s1 + $0xc8] sm:$0xff]  ;;  %v320_v48 = vpack.c.bf16 %v25_v40, %v24_v37 }
   0xc   :  { %347 = vmatprep.subr.bf16.mxu1 %v346_v34  ;;  %v350_v43 = vpack.c.bf16 %v73_v42, %v72_v41  ;;  %v57_v45 = vld [vmem:[%s600_s1 + $0x138] sm:$0xff]  ;;  %v74_v49 = vld [vmem:[%s600_s1 + $0x1c0] sm:$0xff]  ;;  %v75_v50 = vld [vmem:[%s600_s1 + $0x1c8] sm:$0xff]  ;;  %v322_v52 = vpack.c.bf16 %v43_v47, %v42_v46 }
   0xd   :  { %317 = vmatpush3.bf16.msra.mxu0 %v316_v33  ;;  %v352_v51 = vpack.c.bf16 %v57_v45, %v56_v44  ;;  %v26_v53 = vld [vmem:[%s600_s1 + $0x40] sm:$0xff]  ;;  %v27_v54 = vld [vmem:[%s600_s1 + $0x48] sm:$0xff]  ;;  %v354_v56 = vpack.c.bf16 %v75_v50, %v74_v49  ;;  %v44_v58 = vld [vmem:[%s600_s1 + $0xd0] sm:$0xff] }
   0xe   :  { %319 = vmatprep.subr.bf16.mxu0 %v318_v39  ;;  %v58_v55 = vld [vmem:[%s600_s1 + $0x140] sm:$0xff]  ;;  %v59_v57 = vld [vmem:[%s600_s1 + $0x148] sm:$0xff]  ;;  %v45_v59 = vld [vmem:[%s600_s1 + $0xd8] sm:$0xff]  ;;  %v324_v62 = vpack.c.bf16 %v27_v54, %v26_v53 }
   0xf   :  { %349 = vmatpush3.bf16.msra.mxu1 %v348_v38  ;;  %v76_v60 = vld [vmem:[%s600_s1 + $0x1d0] sm:$0xff]  ;;  %v77_v61 = vld [vmem:[%s600_s1 + $0x1d8] sm:$0xff]  ;;  %v356_v63 = vpack.c.bf16 %v59_v57, %v58_v55  ;;  %v326_v0 = vpack.c.bf16 %v45_v59, %v44_v58  ;;  %v46_v6 = vld [vmem:[%s600_s1 + $0xe0] sm:$0xff] }
  0x10   :  { %351 = vmatprep.subr.bf16.mxu1 %v350_v43  ;;  %v28_v1 = vld [vmem:[%s600_s1 + $0x50] sm:$0xff]  ;;  %v29_v2 = vld [vmem:[%s600_s1 + $0x58] sm:$0xff]  ;;  %v358_v4 = vpack.c.bf16 %v77_v61, %v76_v60  ;;  %v47_v7 = vld [vmem:[%s600_s1 + $0xe8] sm:$0xff] }
  0x11   :  { %321 = vmatpush3.bf16.msra.mxu0 %v320_v48  ;;  %v60_v3 = vld [vmem:[%s600_s1 + $0x150] sm:$0xff]  ;;  %v61_v5 = vld [vmem:[%s600_s1 + $0x158] sm:$0xff]  ;;  %v78_v8 = vld [vmem:[%s600_s1 + $0x1e0] sm:$0xff]  ;;  %v328_v10 = vpack.c.bf16 %v29_v2, %v28_v1  ;;  %v330_v14 = vpack.c.bf16 %v47_v7, %v46_v6 }
  0x12   :  { %323 = vmatprep.subr.bf16.mxu0 %v322_v52  ;;  %v79_v9 = vld [vmem:[%s600_s1 + $0x1e8] sm:$0xff]  ;;  %v30_v11 = vld [vmem:[%s600_s1 + $0x60] sm:$0xff]  ;;  %v360_v13 = vpack.c.bf16 %v61_v5, %v60_v3  ;;  %v48_v19 = vld [vmem:[%s600_s1 + $0xf0] sm:$0xff] }
  0x13   :  { %353 = vmatpush3.bf16.msra.mxu1 %v352_v51  ;;  %v31_v12 = vld [vmem:[%s600_s1 + $0x68] sm:$0xff]  ;;  %v62_v15 = vld [vmem:[%s600_s1 + $0x160] sm:$0xff]  ;;  %v362_v18 = vpack.c.bf16 %v79_v9, %v78_v8  ;;  %v49_v20 = vld [vmem:[%s600_s1 + $0xf8] sm:$0xff] }
  0x14   :  { %355 = vmatprep.subr.bf16.mxu1 %v354_v56  ;;  %v63_v16 = vld [vmem:[%s600_s1 + $0x168] sm:$0xff]  ;;  %v17_v21 = vld [vmem:[%s601_s0 + $0x18] sm:$0xff]  ;;  %v80_v22 = vld [vmem:[%s600_s1 + $0x1f0] sm:$0xff]  ;;  %v332_v24 = vpack.c.bf16 %v31_v12, %v30_v11  ;;  %v334_v26 = vpack.c.bf16 %v49_v20, %v48_v19 }
  0x15   :  { %325 = vmatpush3.bf16.msra.mxu0 %v324_v62  ;;  %v15_v17 = vld [vmem:[%s601_s0 + $0x8] sm:$0xff]  ;;  %v81_v23 = vld [vmem:[%s600_s1 + $0x1f8] sm:$0xff]  ;;  %223 = vmatprep.mubr.f32.mxu1 %v17_v21  ;;  %v364_v25 = vpack.c.bf16 %v63_v16, %v62_v15  ;;  %v32_v27 = vld [vmem:[%s600_s1 + $0x70] sm:$0xff] }
  0x16   :  { %327 = vmatprep.subr.bf16.mxu0 %v326_v0  ;;  %153 = vmatprep.mubr.f32.mxu0 %v15_v17  ;;  %v33_v28 = vld [vmem:[%s600_s1 + $0x78] sm:$0xff]  ;;  %v366_v29 = vpack.c.bf16 %v81_v23, %v80_v22  ;;  %v64_v30 = vld [vmem:[%s600_s1 + $0x170] sm:$0xff]  ;;  %v14_v34 = vld [vmem:[%s601_s0] sm:$0xff] }
  0x17   :  { %357 = vmatpush3.bf16.msra.mxu1 %v356_v63  ;;  %v65_v31 = vld [vmem:[%s600_s1 + $0x178] sm:$0xff]  ;;  %v336_v32 = vpack.c.bf16 %v33_v28, %v32_v27  ;;  %v16_v35 = vld [vmem:[%s601_s0 + $0x10] sm:$0xff]  ;;  %v235_v37 = vld [vmem:[%s602_s2] ss:$0 sm:$0xff] }
  0x18   :  { %359 = vmatprep.subr.bf16.mxu1 %v358_v4  ;;  %v368_v33 = vpack.c.bf16 %v65_v31, %v64_v30 }
  0x19   :  { %329 = vmatpush3.bf16.msra.mxu0 %v328_v10 }
  0x1a   :  { %331 = vmatprep.subr.bf16.mxu0 %v330_v14 }
  0x1b   :  { %361 = vmatpush3.bf16.msra.mxu1 %v360_v13 }
  0x1c   :  { %363 = vmatprep.subr.bf16.mxu1 %v362_v18 }
  0x1d   :  { %333 = vmatpush3.bf16.msra.mxu0 %v332_v24 }
  0x1e   :  { %335 = vmatprep.subr.bf16.mxu0 %v334_v26 }
  0x1f   :  { %365 = vmatpush3.bf16.msra.mxu1 %v364_v25 }
  0x20   :  { %367 = vmatprep.subr.bf16.mxu1 %v366_v29 }
  0x21   :  { %337 = vmatpush3.bf16.msra.mxu0 %v336_v32 }
  0x23   :  { %369 = vmatpush3.bf16.msra.mxu1 %v368_v33 }
  0x24   :  { %154 = vmatmul.mubr.f32.vlgmr.msra.gmra.mrb[0].mxu0 %v14_v34 }
  0x26   :  { %224 = vmatmul.mubr.f32.vlgmr.msra.gmra.mrb[0].mxu1 %v16_v35 }
  0xf7   :  { %v268_v36 = vpop.f32.mrb[0].mxu0 }
  0xf8   :  { %v269_v38 = vpop.f32.mrb[1].mxu0 }
  0xf9   :  { %v303_v39 = vpop.f32.mrb[0].mxu1  ;;  %v270_v40 = vadd.f32 %v269_v38, %v268_v36 }
  0xfa   :  { %v304_v41 = vpop.f32.mrb[1].mxu1 }
  0xfb   :  { %v305_v42 = vadd.f32 %v304_v41, %v303_v39  ;;  %v156_v43 = vadd.f32 %v270_v40, %v235_v37 }
  0xfd   :  { %v226_v44 = vadd.f32 %v305_v42, %v156_v43 }
  0xff   :  { %230 = vst.msk [vmem:[%s603_s3] sm:$0xff] %vm229_vm0, %v226_v44 }

</bundles_post_ra>
